<compile_context>
chip_gen: v7x
topology: tpu7x:2x2x1
jax: 0.10.0
libtpu: 0.0.40
codegen_flags: <defaults>
</compile_context>

<pallas_src>
import numpy as np
import jax
import jax.numpy as jnp
from jax.experimental import pallas as pl
from jax.experimental.pallas import tpu as pltpu

# ---- config (mirrors the PyTorch `config` module) ---------------------------
NUM_EMBEDDING = 16    # config.num_embedding (vocab size)
EMBEDDING_DIM = 32    # config.embedding_dim
HIDDEN_SIZE = 32      # config.hidden_size
NUM_LAYER = 1         # config.num_layer
PAD = 0               # config.num_sequence.PAD (also padding_value)
BATCH = 2
MAX_LEN = 8


def _sigmoid(x):
    # logistic written around the EUP approx reciprocal (keeps the divide off
    # the VALU; exp/recip both go to the single EUP slot, off the serial VPU path)
    return pl.reciprocal(1.0 + jnp.exp(-x), approx=True)


# ---- Pallas kernel: GRU recurrence with length masking ----------------------
def gru_encoder_kernel(len_ref, gi_ref, whh_ref, bhh_ref, out_ref, hN_ref):
    # len_ref : [B, 1] int32   sequence lengths
    # gi_ref  : [T, B, 3H]     precomputed input-gate activations (x@Wih + bih)
    # whh_ref : [H, 3H]        fused hidden weights (gate order r, z, n)
    # bhh_ref : [1, 3H]        fused hidden bias
    # out_ref : [B, T*H]       lane-dense output slab (PAD-filled beyond length)
    # hN_ref  : [B, H]         hidden at last valid timestep
    T, B, _ = gi_ref.shape
    H = hN_ref.shape[-1]

    # loop-invariant loads, hoisted out of the recurrence
    lens = len_ref[...]          # [B, 1] int32
    whh = whh_ref[...]           # [H, 3H]
    bhh = bhh_ref[...]           # [1, 3H]
    gi_all = gi_ref[...]         # [T, B, 3H] (~6 KiB, stays in vregs)

    h = jnp.zeros((B, H), jnp.float32)   # GRU initial hidden = 0 (carried in vregs)
    outs = []
    for t in range(T):           # fully unrolled: static indices, max scheduler visibility
        gi = gi_all[t]           # [B, 3H] register slice, no per-step VMEM load
        # single fused MXU push per step: only the h-dependent matmul is serial
        gh = jnp.dot(h, whh, preferred_element_type=jnp.float32) + bhh   # [B, 3H]
        r = _sigmoid(gi[:, 0:H] + gh[:, 0:H])
        z = _sigmoid(gi[:, H:2 * H] + gh[:, H:2 * H])
        n = jnp.tanh(gi[:, 2 * H:3 * H] + r * gh[:, 2 * H:3 * H])
        h_new = (1.0 - z) * n + z * h                     # [B, H]

        valid = t < lens                                  # [B, 1] bool (pack semantics)
        h = jnp.where(valid, h_new, h)                    # freeze past length
        outs.append(jnp.where(valid, h_new, jnp.float32(PAD)))  # pad_packed fill

    out_ref[...] = jnp.concatenate(outs, axis=-1)         # one lane-dense [B, T*H] store
    hN_ref[...] = h


# ---- parameter init (deterministic, PyTorch-equivalent, fused gate layout) ---
def init_params(key):
    k_emb, k1, k2, k3, k4 = jax.random.split(key, 5)
    emb = jax.random.normal(k_emb, (NUM_EMBEDDING, EMBEDDING_DIM), jnp.float32)
    emb = emb.at[PAD].set(0.0)     # padding_idx=PAD -> zero embedding row
    bound = 1.0 / np.sqrt(HIDDEN_SIZE)
    # fused gate layout: columns [0:H]=r, [H:2H]=z, [2H:3H]=n
    wih = jax.random.uniform(k1, (EMBEDDING_DIM, 3 * HIDDEN_SIZE), jnp.float32, -bound, bound)
    whh = jax.random.uniform(k2, (HIDDEN_SIZE, 3 * HIDDEN_SIZE), jnp.float32, -bound, bound)
    bih = jax.random.uniform(k3, (1, 3 * HIDDEN_SIZE), jnp.float32, -bound, bound)
    bhh = jax.random.uniform(k4, (1, 3 * HIDDEN_SIZE), jnp.float32, -bound, bound)
    return emb, wih, whh, bih, bhh


# ---- forward (wrapper = glue; recurrence = Pallas kernel) --------------------
def num_encoder_forward(params, input_ids, input_length):
    emb_table, wih, whh, bih, bhh = params
    B, T = input_ids.shape
    H = HIDDEN_SIZE

    # token -> fused input-gate table ([16, 3H] = 6 KiB): removes all input-side
    # MXU work and the [B,T,E] embedding gather from the serial recurrence.
    gi_table = jnp.dot(emb_table, wih, preferred_element_type=jnp.float32) + bih  # [V, 3H]
    gi_tbg = jnp.transpose(gi_table[input_ids], (1, 0, 2))                        # [T, B, 3H]
    lengths = jnp.asarray(input_length, jnp.int32).reshape(B, 1)

    out_flat, h_last = pl.pallas_call(
        gru_encoder_kernel,
        out_shape=(jax.ShapeDtypeStruct((B, T * H), jnp.float32),
                   jax.ShapeDtypeStruct((B, H), jnp.float32)),
        in_specs=[pl.BlockSpec(memory_space=pltpu.MemorySpace.VMEM)] * 4,
        out_specs=(pl.BlockSpec(memory_space=pltpu.MemorySpace.VMEM),
                   pl.BlockSpec(memory_space=pltpu.MemorySpace.VMEM)),
    )(lengths, gi_tbg, whh, bhh)

    # pad_packed_sequence trims the time dim to max(input_length)
    t_out = int(np.max(np.asarray(input_length)))
    output = out_flat.reshape(B, T, H)[:, :t_out, :]   # [B, T_out, H]
    hidden = h_last[None, :, :]                        # [NUM_LAYER, B, H]
    return output, hidden


# ---- pure-JAX reference (for correctness check) ------------------------------
def reference_forward(params, input_ids, input_length):
    emb_table, wih, whh, bih, bhh = params
    B, T = input_ids.shape
    H = HIDDEN_SIZE
    x = emb_table[input_ids]                     # [B, T, E]
    lengths = jnp.asarray(input_length, jnp.int32)
    h = jnp.zeros((B, H), jnp.float32)
    outs = []
    for t in range(T):
        gi = x[:, t, :] @ wih + bih              # [B, 3H]
        gh = h @ whh + bhh                       # [B, 3H]
        r = jax.nn.sigmoid(gi[:, 0:H] + gh[:, 0:H])
        z = jax.nn.sigmoid(gi[:, H:2 * H] + gh[:, H:2 * H])
        n = jnp.tanh(gi[:, 2 * H:] + r * gh[:, 2 * H:])
        h_new = (1.0 - z) * n + z * h
        valid = (t < lengths)[:, None]
        h = jnp.where(valid, h_new, h)
        outs.append(jnp.where(valid, h_new, 0.0))
    out = jnp.stack(outs, axis=1)
    t_out = int(np.max(np.asarray(input_length)))
    return out[:, :t_out], h[None]


if __name__ == "__main__":
    key = jax.random.PRNGKey(0)
    k_params, k_ids = jax.random.split(key)
    params = init_params(k_params)

    # deterministic inputs: descending lengths (pack_padded_sequence default)
    input_length = np.array([MAX_LEN, 5], dtype=np.int32)         # [B]
    ids = jax.random.randint(k_ids, (BATCH, MAX_LEN), 1, NUM_EMBEDDING, jnp.int32)
    t_idx = jnp.arange(MAX_LEN)[None, :]
    input_ids = jnp.where(t_idx < jnp.asarray(input_length)[:, None], ids, PAD)

    out, hidden = num_encoder_forward(params, input_ids, input_length)
    jax.block_until_ready(out)
    jax.block_until_ready(hidden)

    out_ref, hidden_ref = reference_forward(params, input_ids, input_length)
    assert out.shape == out_ref.shape and hidden.shape == (NUM_LAYER, BATCH, HIDDEN_SIZE)
    # slightly relaxed tolerance: in-kernel sigmoid uses the EUP approx reciprocal
    np.testing.assert_allclose(np.asarray(out), np.asarray(out_ref), atol=2e-3, rtol=2e-3)
    np.testing.assert_allclose(np.asarray(hidden), np.asarray(hidden_ref), atol=2e-3, rtol=2e-3)

    print("KERNEL_OK")
</pallas_src>

<mosaic_0001>
module attributes {stable_mosaic.version = 11 : i64} {
  func.func @gru_encoder_kernel(%arg0: memref<2x1xi32, #tpu.memory_space<vmem>>, %arg1: memref<8x2x96xf32, #tpu.memory_space<vmem>>, %arg2: memref<32x96xf32, #tpu.memory_space<vmem>>, %arg3: memref<1x96xf32, #tpu.memory_space<vmem>>, %arg4: memref<2x256xf32, #tpu.memory_space<vmem>>, %arg5: memref<2x32xf32, #tpu.memory_space<vmem>>) attributes {dimension_semantics = [], scalar_prefetch = 0 : i64, scratch_operands = 0 : i64, tpu.core_type = #tpu.core_type<tc>} {
    %c0 = arith.constant 0 : index
    %c0_0 = arith.constant 0 : index
    %0 = vector.load %arg0[%c0, %c0_0] : memref<2x1xi32, #tpu.memory_space<vmem>>, vector<2x1xi32>
    %c0_1 = arith.constant 0 : index
    %c0_2 = arith.constant 0 : index
    %1 = vector.load %arg2[%c0_1, %c0_2] : memref<32x96xf32, #tpu.memory_space<vmem>>, vector<32x96xf32>
    %c0_3 = arith.constant 0 : index
    %c0_4 = arith.constant 0 : index
    %2 = vector.load %arg3[%c0_3, %c0_4] : memref<1x96xf32, #tpu.memory_space<vmem>>, vector<1x96xf32>
    %c0_5 = arith.constant 0 : index
    %c0_6 = arith.constant 0 : index
    %c0_7 = arith.constant 0 : index
    %3 = vector.load %arg1[%c0_5, %c0_6, %c0_7] : memref<8x2x96xf32, #tpu.memory_space<vmem>>, vector<8x2x96xf32>
    %cst = arith.constant 0.000000e+00 : f32
    %4 = vector.broadcast %cst : f32 to vector<2x32xf32>
    %5 = vector.extract_strided_slice %3 {offsets = [0, 0, 0], sizes = [1, 2, 96], strides = [1, 1, 1]} : vector<8x2x96xf32> to vector<1x2x96xf32>
    %6 = vector.shape_cast %5 : vector<1x2x96xf32> to vector<2x96xf32>
    %cst_8 = arith.constant dense<0.000000e+00> : vector<2x96xf32>
    %7 = tpu.matmul %4, %1, %cst_8 {dimension_numbers = #tpu.dot_dimension_numbers<[1], [0], [0], [1], [0, 0, 1, 1], [], []>} : vector<2x32xf32>, vector<32x96xf32>, vector<2x96xf32> -> vector<2x96xf32>
    %8 = vector.broadcast %2 : vector<1x96xf32> to vector<2x96xf32>
    %9 = arith.addf %7, %8 : vector<2x96xf32>
    %10 = vector.extract_strided_slice %6 {offsets = [0, 0], sizes = [2, 32], strides = [1, 1]} : vector<2x96xf32> to vector<2x32xf32>
    %11 = vector.extract_strided_slice %9 {offsets = [0, 0], sizes = [2, 32], strides = [1, 1]} : vector<2x96xf32> to vector<2x32xf32>
    %12 = arith.addf %10, %11 : vector<2x32xf32>
    %cst_9 = arith.constant 0.000000e+00 : f32
    %13 = vector.broadcast %cst_9 : f32 to vector<2x32xf32>
    %14 = arith.subf %13, %12 : vector<2x32xf32>
    %15 = math.exp %14 : vector<2x32xf32>
    %cst_10 = arith.constant 1.000000e+00 : f32
    %16 = vector.broadcast %cst_10 : f32 to vector<2x32xf32>
    %17 = arith.addf %16, %15 : vector<2x32xf32>
    %18 = tpu.reciprocal %17 {approx = true} : vector<2x32xf32> -> vector<2x32xf32>
    %19 = vector.extract_strided_slice %6 {offsets = [0, 32], sizes = [2, 32], strides = [1, 1]} : vector<2x96xf32> to vector<2x32xf32>
    %20 = vector.extract_strided_slice %9 {offsets = [0, 32], sizes = [2, 32], strides = [1, 1]} : vector<2x96xf32> to vector<2x32xf32>
    %21 = arith.addf %19, %20 : vector<2x32xf32>
    %cst_11 = arith.constant 0.000000e+00 : f32
    %22 = vector.broadcast %cst_11 : f32 to vector<2x32xf32>
    %23 = arith.subf %22, %21 : vector<2x32xf32>
    %24 = math.exp %23 : vector<2x32xf32>
    %cst_12 = arith.constant 1.000000e+00 : f32
    %25 = vector.broadcast %cst_12 : f32 to vector<2x32xf32>
    %26 = arith.addf %25, %24 : vector<2x32xf32>
    %27 = tpu.reciprocal %26 {approx = true} : vector<2x32xf32> -> vector<2x32xf32>
    %28 = vector.extract_strided_slice %6 {offsets = [0, 64], sizes = [2, 32], strides = [1, 1]} : vector<2x96xf32> to vector<2x32xf32>
    %29 = vector.extract_strided_slice %9 {offsets = [0, 64], sizes = [2, 32], strides = [1, 1]} : vector<2x96xf32> to vector<2x32xf32>
    %30 = arith.mulf %18, %29 : vector<2x32xf32>
    %31 = arith.addf %28, %30 : vector<2x32xf32>
    %32 = math.tanh %31 : vector<2x32xf32>
    %cst_13 = arith.constant 1.000000e+00 : f32
    %33 = vector.broadcast %cst_13 : f32 to vector<2x32xf32>
    %34 = arith.subf %33, %27 : vector<2x32xf32>
    %35 = arith.mulf %34, %32 : vector<2x32xf32>
    %36 = arith.mulf %27, %4 : vector<2x32xf32>
    %37 = arith.addf %35, %36 : vector<2x32xf32>
    %c0_i32 = arith.constant 0 : i32
    %38 = vector.broadcast %c0_i32 : i32 to vector<2x1xi32>
    %39 = arith.cmpi sgt, %0, %38 : vector<2x1xi32>
    %40 = vector.shape_cast %39 : vector<2x1xi1> to vector<2x1xi1>
    %41 = vector.broadcast %40 : vector<2x1xi1> to vector<2x32xi1>
    %42 = arith.select %41, %37, %4 : vector<2x32xi1>, vector<2x32xf32>
    %cst_14 = arith.constant 0.000000e+00 : f32
    %43 = vector.shape_cast %39 : vector<2x1xi1> to vector<2x1xi1>
    %44 = vector.broadcast %43 : vector<2x1xi1> to vector<2x32xi1>
    %45 = vector.broadcast %cst_14 : f32 to vector<2x32xf32>
    %46 = arith.select %44, %37, %45 : vector<2x32xi1>, vector<2x32xf32>
    %47 = vector.extract_strided_slice %3 {offsets = [1, 0, 0], sizes = [1, 2, 96], strides = [1, 1, 1]} : vector<8x2x96xf32> to vector<1x2x96xf32>
    %48 = vector.shape_cast %47 : vector<1x2x96xf32> to vector<2x96xf32>
    %cst_15 = arith.constant dense<0.000000e+00> : vector<2x96xf32>
    %49 = tpu.matmul %42, %1, %cst_15 {dimension_numbers = #tpu.dot_dimension_numbers<[1], [0], [0], [1], [0, 0, 1, 1], [], []>} : vector<2x32xf32>, vector<32x96xf32>, vector<2x96xf32> -> vector<2x96xf32>
    %50 = vector.broadcast %2 : vector<1x96xf32> to vector<2x96xf32>
    %51 = arith.addf %49, %50 : vector<2x96xf32>
    %52 = vector.extract_strided_slice %48 {offsets = [0, 0], sizes = [2, 32], strides = [1, 1]} : vector<2x96xf32> to vector<2x32xf32>
    %53 = vector.extract_strided_slice %51 {offsets = [0, 0], sizes = [2, 32], strides = [1, 1]} : vector<2x96xf32> to vector<2x32xf32>
    %54 = arith.addf %52, %53 : vector<2x32xf32>
    %cst_16 = arith.constant 0.000000e+00 : f32
    %55 = vector.broadcast %cst_16 : f32 to vector<2x32xf32>
    %56 = arith.subf %55, %54 : vector<2x32xf32>
    %57 = math.exp %56 : vector<2x32xf32>
    %cst_17 = arith.constant 1.000000e+00 : f32
    %58 = vector.broadcast %cst_17 : f32 to vector<2x32xf32>
    %59 = arith.addf %58, %57 : vector<2x32xf32>
    %60 = tpu.reciprocal %59 {approx = true} : vector<2x32xf32> -> vector<2x32xf32>
    %61 = vector.extract_strided_slice %48 {offsets = [0, 32], sizes = [2, 32], strides = [1, 1]} : vector<2x96xf32> to vector<2x32xf32>
    %62 = vector.extract_strided_slice %51 {offsets = [0, 32], sizes = [2, 32], strides = [1, 1]} : vector<2x96xf32> to vector<2x32xf32>
    %63 = arith.addf %61, %62 : vector<2x32xf32>
    %cst_18 = arith.constant 0.000000e+00 : f32
    %64 = vector.broadcast %cst_18 : f32 to vector<2x32xf32>
    %65 = arith.subf %64, %63 : vector<2x32xf32>
    %66 = math.exp %65 : vector<2x32xf32>
    %cst_19 = arith.constant 1.000000e+00 : f32
    %67 = vector.broadcast %cst_19 : f32 to vector<2x32xf32>
    %68 = arith.addf %67, %66 : vector<2x32xf32>
    %69 = tpu.reciprocal %68 {approx = true} : vector<2x32xf32> -> vector<2x32xf32>
    %70 = vector.extract_strided_slice %48 {offsets = [0, 64], sizes = [2, 32], strides = [1, 1]} : vector<2x96xf32> to vector<2x32xf32>
    %71 = vector.extract_strided_slice %51 {offsets = [0, 64], sizes = [2, 32], strides = [1, 1]} : vector<2x96xf32> to vector<2x32xf32>
    %72 = arith.mulf %60, %71 : vector<2x32xf32>
    %73 = arith.addf %70, %72 : vector<2x32xf32>
    %74 = math.tanh %73 : vector<2x32xf32>
    %cst_20 = arith.constant 1.000000e+00 : f32
    %75 = vector.broadcast %cst_20 : f32 to vector<2x32xf32>
    %76 = arith.subf %75, %69 : vector<2x32xf32>
    %77 = arith.mulf %76, %74 : vector<2x32xf32>
    %78 = arith.mulf %69, %42 : vector<2x32xf32>
    %79 = arith.addf %77, %78 : vector<2x32xf32>
    %c1_i32 = arith.constant 1 : i32
    %80 = vector.broadcast %c1_i32 : i32 to vector<2x1xi32>
    %81 = arith.cmpi sgt, %0, %80 : vector<2x1xi32>
    %82 = vector.shape_cast %81 : vector<2x1xi1> to vector<2x1xi1>
    %83 = vector.broadcast %82 : vector<2x1xi1> to vector<2x32xi1>
    %84 = arith.select %83, %79, %42 : vector<2x32xi1>, vector<2x32xf32>
    %cst_21 = arith.constant 0.000000e+00 : f32
    %85 = vector.shape_cast %81 : vector<2x1xi1> to vector<2x1xi1>
    %86 = vector.broadcast %85 : vector<2x1xi1> to vector<2x32xi1>
    %87 = vector.broadcast %cst_21 : f32 to vector<2x32xf32>
    %88 = arith.select %86, %79, %87 : vector<2x32xi1>, vector<2x32xf32>
    %89 = vector.extract_strided_slice %3 {offsets = [2, 0, 0], sizes = [1, 2, 96], strides = [1, 1, 1]} : vector<8x2x96xf32> to vector<1x2x96xf32>
    %90 = vector.shape_cast %89 : vector<1x2x96xf32> to vector<2x96xf32>
    %cst_22 = arith.constant dense<0.000000e+00> : vector<2x96xf32>
    %91 = tpu.matmul %84, %1, %cst_22 {dimension_numbers = #tpu.dot_dimension_numbers<[1], [0], [0], [1], [0, 0, 1, 1], [], []>} : vector<2x32xf32>, vector<32x96xf32>, vector<2x96xf32> -> vector<2x96xf32>
    %92 = vector.broadcast %2 : vector<1x96xf32> to vector<2x96xf32>
    %93 = arith.addf %91, %92 : vector<2x96xf32>
    %94 = vector.extract_strided_slice %90 {offsets = [0, 0], sizes = [2, 32], strides = [1, 1]} : vector<2x96xf32> to vector<2x32xf32>
    %95 = vector.extract_strided_slice %93 {offsets = [0, 0], sizes = [2, 32], strides = [1, 1]} : vector<2x96xf32> to vector<2x32xf32>
    %96 = arith.addf %94, %95 : vector<2x32xf32>
    %cst_23 = arith.constant 0.000000e+00 : f32
    %97 = vector.broadcast %cst_23 : f32 to vector<2x32xf32>
    %98 = arith.subf %97, %96 : vector<2x32xf32>
    %99 = math.exp %98 : vector<2x32xf32>
    %cst_24 = arith.constant 1.000000e+00 : f32
    %100 = vector.broadcast %cst_24 : f32 to vector<2x32xf32>
    %101 = arith.addf %100, %99 : vector<2x32xf32>
    %102 = tpu.reciprocal %101 {approx = true} : vector<2x32xf32> -> vector<2x32xf32>
    %103 = vector.extract_strided_slice %90 {offsets = [0, 32], sizes = [2, 32], strides = [1, 1]} : vector<2x96xf32> to vector<2x32xf32>
    %104 = vector.extract_strided_slice %93 {offsets = [0, 32], sizes = [2, 32], strides = [1, 1]} : vector<2x96xf32> to vector<2x32xf32>
    %105 = arith.addf %103, %104 : vector<2x32xf32>
    %cst_25 = arith.constant 0.000000e+00 : f32
    %106 = vector.broadcast %cst_25 : f32 to vector<2x32xf32>
    %107 = arith.subf %106, %105 : vector<2x32xf32>
    %108 = math.exp %107 : vector<2x32xf32>
    %cst_26 = arith.constant 1.000000e+00 : f32
    %109 = vector.broadcast %cst_26 : f32 to vector<2x32xf32>
    %110 = arith.addf %109, %108 : vector<2x32xf32>
    %111 = tpu.reciprocal %110 {approx = true} : vector<2x32xf32> -> vector<2x32xf32>
    %112 = vector.extract_strided_slice %90 {offsets = [0, 64], sizes = [2, 32], strides = [1, 1]} : vector<2x96xf32> to vector<2x32xf32>
    %113 = vector.extract_strided_slice %93 {offsets = [0, 64], sizes = [2, 32], strides = [1, 1]} : vector<2x96xf32> to vector<2x32xf32>
    %114 = arith.mulf %102, %113 : vector<2x32xf32>
    %115 = arith.addf %112, %114 : vector<2x32xf32>
    %116 = math.tanh %115 : vector<2x32xf32>
    %cst_27 = arith.constant 1.000000e+00 : f32
    %117 = vector.broadcast %cst_27 : f32 to vector<2x32xf32>
    %118 = arith.subf %117, %111 : vector<2x32xf32>
    %119 = arith.mulf %118, %116 : vector<2x32xf32>
    %120 = arith.mulf %111, %84 : vector<2x32xf32>
    %121 = arith.addf %119, %120 : vector<2x32xf32>
    %c2_i32 = arith.constant 2 : i32
    %122 = vector.broadcast %c2_i32 : i32 to vector<2x1xi32>
    %123 = arith.cmpi sgt, %0, %122 : vector<2x1xi32>
    %124 = vector.shape_cast %123 : vector<2x1xi1> to vector<2x1xi1>
    %125 = vector.broadcast %124 : vector<2x1xi1> to vector<2x32xi1>
    %126 = arith.select %125, %121, %84 : vector<2x32xi1>, vector<2x32xf32>
    %cst_28 = arith.constant 0.000000e+00 : f32
    %127 = vector.shape_cast %123 : vector<2x1xi1> to vector<2x1xi1>
    %128 = vector.broadcast %127 : vector<2x1xi1> to vector<2x32xi1>
    %129 = vector.broadcast %cst_28 : f32 to vector<2x32xf32>
    %130 = arith.select %128, %121, %129 : vector<2x32xi1>, vector<2x32xf32>
    %131 = vector.extract_strided_slice %3 {offsets = [3, 0, 0], sizes = [1, 2, 96], strides = [1, 1, 1]} : vector<8x2x96xf32> to vector<1x2x96xf32>
    %132 = vector.shape_cast %131 : vector<1x2x96xf32> to vector<2x96xf32>
    %cst_29 = arith.constant dense<0.000000e+00> : vector<2x96xf32>
    %133 = tpu.matmul %126, %1, %cst_29 {dimension_numbers = #tpu.dot_dimension_numbers<[1], [0], [0], [1], [0, 0, 1, 1], [], []>} : vector<2x32xf32>, vector<32x96xf32>, vector<2x96xf32> -> vector<2x96xf32>
    %134 = vector.broadcast %2 : vector<1x96xf32> to vector<2x96xf32>
    %135 = arith.addf %133, %134 : vector<2x96xf32>
    %136 = vector.extract_strided_slice %132 {offsets = [0, 0], sizes = [2, 32], strides = [1, 1]} : vector<2x96xf32> to vector<2x32xf32>
    %137 = vector.extract_strided_slice %135 {offsets = [0, 0], sizes = [2, 32], strides = [1, 1]} : vector<2x96xf32> to vector<2x32xf32>
    %138 = arith.addf %136, %137 : vector<2x32xf32>
    %cst_30 = arith.constant 0.000000e+00 : f32
    %139 = vector.broadcast %cst_30 : f32 to vector<2x32xf32>
    %140 = arith.subf %139, %138 : vector<2x32xf32>
    %141 = math.exp %140 : vector<2x32xf32>
    %cst_31 = arith.constant 1.000000e+00 : f32
    %142 = vector.broadcast %cst_31 : f32 to vector<2x32xf32>
    %143 = arith.addf %142, %141 : vector<2x32xf32>
    %144 = tpu.reciprocal %143 {approx = true} : vector<2x32xf32> -> vector<2x32xf32>
    %145 = vector.extract_strided_slice %132 {offsets = [0, 32], sizes = [2, 32], strides = [1, 1]} : vector<2x96xf32> to vector<2x32xf32>
    %146 = vector.extract_strided_slice %135 {offsets = [0, 32], sizes = [2, 32], strides = [1, 1]} : vector<2x96xf32> to vector<2x32xf32>
    %147 = arith.addf %145, %146 : vector<2x32xf32>
    %cst_32 = arith.constant 0.000000e+00 : f32
    %148 = vector.broadcast %cst_32 : f32 to vector<2x32xf32>
    %149 = arith.subf %148, %147 : vector<2x32xf32>
    %150 = math.exp %149 : vector<2x32xf32>
    %cst_33 = arith.constant 1.000000e+00 : f32
    %151 = vector.broadcast %cst_33 : f32 to vector<2x32xf32>
    %152 = arith.addf %151, %150 : vector<2x32xf32>
    %153 = tpu.reciprocal %152 {approx = true} : vector<2x32xf32> -> vector<2x32xf32>
    %154 = vector.extract_strided_slice %132 {offsets = [0, 64], sizes = [2, 32], strides = [1, 1]} : vector<2x96xf32> to vector<2x32xf32>
    %155 = vector.extract_strided_slice %135 {offsets = [0, 64], sizes = [2, 32], strides = [1, 1]} : vector<2x96xf32> to vector<2x32xf32>
    %156 = arith.mulf %144, %155 : vector<2x32xf32>
    %157 = arith.addf %154, %156 : vector<2x32xf32>
    %158 = math.tanh %157 : vector<2x32xf32>
    %cst_34 = arith.constant 1.000000e+00 : f32
    %159 = vector.broadcast %cst_34 : f32 to vector<2x32xf32>
    %160 = arith.subf %159, %153 : vector<2x32xf32>
    %161 = arith.mulf %160, %158 : vector<2x32xf32>
    %162 = arith.mulf %153, %126 : vector<2x32xf32>
    %163 = arith.addf %161, %162 : vector<2x32xf32>
    %c3_i32 = arith.constant 3 : i32
    %164 = vector.broadcast %c3_i32 : i32 to vector<2x1xi32>
    %165 = arith.cmpi sgt, %0, %164 : vector<2x1xi32>
    %166 = vector.shape_cast %165 : vector<2x1xi1> to vector<2x1xi1>
    %167 = vector.broadcast %166 : vector<2x1xi1> to vector<2x32xi1>
    %168 = arith.select %167, %163, %126 : vector<2x32xi1>, vector<2x32xf32>
    %cst_35 = arith.constant 0.000000e+00 : f32
    %169 = vector.shape_cast %165 : vector<2x1xi1> to vector<2x1xi1>
    %170 = vector.broadcast %169 : vector<2x1xi1> to vector<2x32xi1>
    %171 = vector.broadcast %cst_35 : f32 to vector<2x32xf32>
    %172 = arith.select %170, %163, %171 : vector<2x32xi1>, vector<2x32xf32>
    %173 = vector.extract_strided_slice %3 {offsets = [4, 0, 0], sizes = [1, 2, 96], strides = [1, 1, 1]} : vector<8x2x96xf32> to vector<1x2x96xf32>
    %174 = vector.shape_cast %173 : vector<1x2x96xf32> to vector<2x96xf32>
    %cst_36 = arith.constant dense<0.000000e+00> : vector<2x96xf32>
    %175 = tpu.matmul %168, %1, %cst_36 {dimension_numbers = #tpu.dot_dimension_numbers<[1], [0], [0], [1], [0, 0, 1, 1], [], []>} : vector<2x32xf32>, vector<32x96xf32>, vector<2x96xf32> -> vector<2x96xf32>
    %176 = vector.broadcast %2 : vector<1x96xf32> to vector<2x96xf32>
    %177 = arith.addf %175, %176 : vector<2x96xf32>
    %178 = vector.extract_strided_slice %174 {offsets = [0, 0], sizes = [2, 32], strides = [1, 1]} : vector<2x96xf32> to vector<2x32xf32>
    %179 = vector.extract_strided_slice %177 {offsets = [0, 0], sizes = [2, 32], strides = [1, 1]} : vector<2x96xf32> to vector<2x32xf32>
    %180 = arith.addf %178, %179 : vector<2x32xf32>
    %cst_37 = arith.constant 0.000000e+00 : f32
    %181 = vector.broadcast %cst_37 : f32 to vector<2x32xf32>
    %182 = arith.subf %181, %180 : vector<2x32xf32>
    %183 = math.exp %182 : vector<2x32xf32>
    %cst_38 = arith.constant 1.000000e+00 : f32
    %184 = vector.broadcast %cst_38 : f32 to vector<2x32xf32>
    %185 = arith.addf %184, %183 : vector<2x32xf32>
    %186 = tpu.reciprocal %185 {approx = true} : vector<2x32xf32> -> vector<2x32xf32>
    %187 = vector.extract_strided_slice %174 {offsets = [0, 32], sizes = [2, 32], strides = [1, 1]} : vector<2x96xf32> to vector<2x32xf32>
    %188 = vector.extract_strided_slice %177 {offsets = [0, 32], sizes = [2, 32], strides = [1, 1]} : vector<2x96xf32> to vector<2x32xf32>
    %189 = arith.addf %187, %188 : vector<2x32xf32>
    %cst_39 = arith.constant 0.000000e+00 : f32
    %190 = vector.broadcast %cst_39 : f32 to vector<2x32xf32>
    %191 = arith.subf %190, %189 : vector<2x32xf32>
    %192 = math.exp %191 : vector<2x32xf32>
    %cst_40 = arith.constant 1.000000e+00 : f32
    %193 = vector.broadcast %cst_40 : f32 to vector<2x32xf32>
    %194 = arith.addf %193, %192 : vector<2x32xf32>
    %195 = tpu.reciprocal %194 {approx = true} : vector<2x32xf32> -> vector<2x32xf32>
    %196 = vector.extract_strided_slice %174 {offsets = [0, 64], sizes = [2, 32], strides = [1, 1]} : vector<2x96xf32> to vector<2x32xf32>
    %197 = vector.extract_strided_slice %177 {offsets = [0, 64], sizes = [2, 32], strides = [1, 1]} : vector<2x96xf32> to vector<2x32xf32>
    %198 = arith.mulf %186, %197 : vector<2x32xf32>
    %199 = arith.addf %196, %198 : vector<2x32xf32>
    %200 = math.tanh %199 : vector<2x32xf32>
    %cst_41 = arith.constant 1.000000e+00 : f32
    %201 = vector.broadcast %cst_41 : f32 to vector<2x32xf32>
    %202 = arith.subf %201, %195 : vector<2x32xf32>
    %203 = arith.mulf %202, %200 : vector<2x32xf32>
    %204 = arith.mulf %195, %168 : vector<2x32xf32>
    %205 = arith.addf %203, %204 : vector<2x32xf32>
    %c4_i32 = arith.constant 4 : i32
    %206 = vector.broadcast %c4_i32 : i32 to vector<2x1xi32>
    %207 = arith.cmpi sgt, %0, %206 : vector<2x1xi32>
    %208 = vector.shape_cast %207 : vector<2x1xi1> to vector<2x1xi1>
    %209 = vector.broadcast %208 : vector<2x1xi1> to vector<2x32xi1>
    %210 = arith.select %209, %205, %168 : vector<2x32xi1>, vector<2x32xf32>
    %cst_42 = arith.constant 0.000000e+00 : f32
    %211 = vector.shape_cast %207 : vector<2x1xi1> to vector<2x1xi1>
    %212 = vector.broadcast %211 : vector<2x1xi1> to vector<2x32xi1>
    %213 = vector.broadcast %cst_42 : f32 to vector<2x32xf32>
    %214 = arith.select %212, %205, %213 : vector<2x32xi1>, vector<2x32xf32>
    %215 = vector.extract_strided_slice %3 {offsets = [5, 0, 0], sizes = [1, 2, 96], strides = [1, 1, 1]} : vector<8x2x96xf32> to vector<1x2x96xf32>
    %216 = vector.shape_cast %215 : vector<1x2x96xf32> to vector<2x96xf32>
    %cst_43 = arith.constant dense<0.000000e+00> : vector<2x96xf32>
    %217 = tpu.matmul %210, %1, %cst_43 {dimension_numbers = #tpu.dot_dimension_numbers<[1], [0], [0], [1], [0, 0, 1, 1], [], []>} : vector<2x32xf32>, vector<32x96xf32>, vector<2x96xf32> -> vector<2x96xf32>
    %218 = vector.broadcast %2 : vector<1x96xf32> to vector<2x96xf32>
    %219 = arith.addf %217, %218 : vector<2x96xf32>
    %220 = vector.extract_strided_slice %216 {offsets = [0, 0], sizes = [2, 32], strides = [1, 1]} : vector<2x96xf32> to vector<2x32xf32>
    %221 = vector.extract_strided_slice %219 {offsets = [0, 0], sizes = [2, 32], strides = [1, 1]} : vector<2x96xf32> to vector<2x32xf32>
    %222 = arith.addf %220, %221 : vector<2x32xf32>
    %cst_44 = arith.constant 0.000000e+00 : f32
    %223 = vector.broadcast %cst_44 : f32 to vector<2x32xf32>
    %224 = arith.subf %223, %222 : vector<2x32xf32>
    %225 = math.exp %224 : vector<2x32xf32>
    %cst_45 = arith.constant 1.000000e+00 : f32
    %226 = vector.broadcast %cst_45 : f32 to vector<2x32xf32>
    %227 = arith.addf %226, %225 : vector<2x32xf32>
    %228 = tpu.reciprocal %227 {approx = true} : vector<2x32xf32> -> vector<2x32xf32>
    %229 = vector.extract_strided_slice %216 {offsets = [0, 32], sizes = [2, 32], strides = [1, 1]} : vector<2x96xf32> to vector<2x32xf32>
    %230 = vector.extract_strided_slice %219 {offsets = [0, 32], sizes = [2, 32], strides = [1, 1]} : vector<2x96xf32> to vector<2x32xf32>
    %231 = arith.addf %229, %230 : vector<2x32xf32>
    %cst_46 = arith.constant 0.000000e+00 : f32
    %232 = vector.broadcast %cst_46 : f32 to vector<2x32xf32>
    %233 = arith.subf %232, %231 : vector<2x32xf32>
    %234 = math.exp %233 : vector<2x32xf32>
    %cst_47 = arith.constant 1.000000e+00 : f32
    %235 = vector.broadcast %cst_47 : f32 to vector<2x32xf32>
    %236 = arith.addf %235, %234 : vector<2x32xf32>
    %237 = tpu.reciprocal %236 {approx = true} : vector<2x32xf32> -> vector<2x32xf32>
    %238 = vector.extract_strided_slice %216 {offsets = [0, 64], sizes = [2, 32], strides = [1, 1]} : vector<2x96xf32> to vector<2x32xf32>
    %239 = vector.extract_strided_slice %219 {offsets = [0, 64], sizes = [2, 32], strides = [1, 1]} : vector<2x96xf32> to vector<2x32xf32>
    %240 = arith.mulf %228, %239 : vector<2x32xf32>
    %241 = arith.addf %238, %240 : vector<2x32xf32>
    %242 = math.tanh %241 : vector<2x32xf32>
    %cst_48 = arith.constant 1.000000e+00 : f32
    %243 = vector.broadcast %cst_48 : f32 to vector<2x32xf32>
    %244 = arith.subf %243, %237 : vector<2x32xf32>
    %245 = arith.mulf %244, %242 : vector<2x32xf32>
    %246 = arith.mulf %237, %210 : vector<2x32xf32>
    %247 = arith.addf %245, %246 : vector<2x32xf32>
    %c5_i32 = arith.constant 5 : i32
    %248 = vector.broadcast %c5_i32 : i32 to vector<2x1xi32>
    %249 = arith.cmpi sgt, %0, %248 : vector<2x1xi32>
    %250 = vector.shape_cast %249 : vector<2x1xi1> to vector<2x1xi1>
    %251 = vector.broadcast %250 : vector<2x1xi1> to vector<2x32xi1>
    %252 = arith.select %251, %247, %210 : vector<2x32xi1>, vector<2x32xf32>
    %cst_49 = arith.constant 0.000000e+00 : f32
    %253 = vector.shape_cast %249 : vector<2x1xi1> to vector<2x1xi1>
    %254 = vector.broadcast %253 : vector<2x1xi1> to vector<2x32xi1>
    %255 = vector.broadcast %cst_49 : f32 to vector<2x32xf32>
    %256 = arith.select %254, %247, %255 : vector<2x32xi1>, vector<2x32xf32>
    %257 = vector.extract_strided_slice %3 {offsets = [6, 0, 0], sizes = [1, 2, 96], strides = [1, 1, 1]} : vector<8x2x96xf32> to vector<1x2x96xf32>
    %258 = vector.shape_cast %257 : vector<1x2x96xf32> to vector<2x96xf32>
    %cst_50 = arith.constant dense<0.000000e+00> : vector<2x96xf32>
    %259 = tpu.matmul %252, %1, %cst_50 {dimension_numbers = #tpu.dot_dimension_numbers<[1], [0], [0], [1], [0, 0, 1, 1], [], []>} : vector<2x32xf32>, vector<32x96xf32>, vector<2x96xf32> -> vector<2x96xf32>
    %260 = vector.broadcast %2 : vector<1x96xf32> to vector<2x96xf32>
    %261 = arith.addf %259, %260 : vector<2x96xf32>
    %262 = vector.extract_strided_slice %258 {offsets = [0, 0], sizes = [2, 32], strides = [1, 1]} : vector<2x96xf32> to vector<2x32xf32>
    %263 = vector.extract_strided_slice %261 {offsets = [0, 0], sizes = [2, 32], strides = [1, 1]} : vector<2x96xf32> to vector<2x32xf32>
    %264 = arith.addf %262, %263 : vector<2x32xf32>
    %cst_51 = arith.constant 0.000000e+00 : f32
    %265 = vector.broadcast %cst_51 : f32 to vector<2x32xf32>
    %266 = arith.subf %265, %264 : vector<2x32xf32>
    %267 = math.exp %266 : vector<2x32xf32>
    %cst_52 = arith.constant 1.000000e+00 : f32
    %268 = vector.broadcast %cst_52 : f32 to vector<2x32xf32>
    %269 = arith.addf %268, %267 : vector<2x32xf32>
    %270 = tpu.reciprocal %269 {approx = true} : vector<2x32xf32> -> vector<2x32xf32>
    %271 = vector.extract_strided_slice %258 {offsets = [0, 32], sizes = [2, 32], strides = [1, 1]} : vector<2x96xf32> to vector<2x32xf32>
    %272 = vector.extract_strided_slice %261 {offsets = [0, 32], sizes = [2, 32], strides = [1, 1]} : vector<2x96xf32> to vector<2x32xf32>
    %273 = arith.addf %271, %272 : vector<2x32xf32>
    %cst_53 = arith.constant 0.000000e+00 : f32
    %274 = vector.broadcast %cst_53 : f32 to vector<2x32xf32>
    %275 = arith.subf %274, %273 : vector<2x32xf32>
    %276 = math.exp %275 : vector<2x32xf32>
    %cst_54 = arith.constant 1.000000e+00 : f32
    %277 = vector.broadcast %cst_54 : f32 to vector<2x32xf32>
    %278 = arith.addf %277, %276 : vector<2x32xf32>
    %279 = tpu.reciprocal %278 {approx = true} : vector<2x32xf32> -> vector<2x32xf32>
    %280 = vector.extract_strided_slice %258 {offsets = [0, 64], sizes = [2, 32], strides = [1, 1]} : vector<2x96xf32> to vector<2x32xf32>
    %281 = vector.extract_strided_slice %261 {offsets = [0, 64], sizes = [2, 32], strides = [1, 1]} : vector<2x96xf32> to vector<2x32xf32>
    %282 = arith.mulf %270, %281 : vector<2x32xf32>
    %283 = arith.addf %280, %282 : vector<2x32xf32>
    %284 = math.tanh %283 : vector<2x32xf32>
    %cst_55 = arith.constant 1.000000e+00 : f32
    %285 = vector.broadcast %cst_55 : f32 to vector<2x32xf32>
    %286 = arith.subf %285, %279 : vector<2x32xf32>
    %287 = arith.mulf %286, %284 : vector<2x32xf32>
    %288 = arith.mulf %279, %252 : vector<2x32xf32>
    %289 = arith.addf %287, %288 : vector<2x32xf32>
    %c6_i32 = arith.constant 6 : i32
    %290 = vector.broadcast %c6_i32 : i32 to vector<2x1xi32>
    %291 = arith.cmpi sgt, %0, %290 : vector<2x1xi32>
    %292 = vector.shape_cast %291 : vector<2x1xi1> to vector<2x1xi1>
    %293 = vector.broadcast %292 : vector<2x1xi1> to vector<2x32xi1>
    %294 = arith.select %293, %289, %252 : vector<2x32xi1>, vector<2x32xf32>
    %cst_56 = arith.constant 0.000000e+00 : f32
    %295 = vector.shape_cast %291 : vector<2x1xi1> to vector<2x1xi1>
    %296 = vector.broadcast %295 : vector<2x1xi1> to vector<2x32xi1>
    %297 = vector.broadcast %cst_56 : f32 to vector<2x32xf32>
    %298 = arith.select %296, %289, %297 : vector<2x32xi1>, vector<2x32xf32>
    %299 = vector.extract_strided_slice %3 {offsets = [7, 0, 0], sizes = [1, 2, 96], strides = [1, 1, 1]} : vector<8x2x96xf32> to vector<1x2x96xf32>
    %300 = vector.shape_cast %299 : vector<1x2x96xf32> to vector<2x96xf32>
    %cst_57 = arith.constant dense<0.000000e+00> : vector<2x96xf32>
    %301 = tpu.matmul %294, %1, %cst_57 {dimension_numbers = #tpu.dot_dimension_numbers<[1], [0], [0], [1], [0, 0, 1, 1], [], []>} : vector<2x32xf32>, vector<32x96xf32>, vector<2x96xf32> -> vector<2x96xf32>
    %302 = vector.broadcast %2 : vector<1x96xf32> to vector<2x96xf32>
    %303 = arith.addf %301, %302 : vector<2x96xf32>
    %304 = vector.extract_strided_slice %300 {offsets = [0, 0], sizes = [2, 32], strides = [1, 1]} : vector<2x96xf32> to vector<2x32xf32>
    %305 = vector.extract_strided_slice %303 {offsets = [0, 0], sizes = [2, 32], strides = [1, 1]} : vector<2x96xf32> to vector<2x32xf32>
    %306 = arith.addf %304, %305 : vector<2x32xf32>
    %cst_58 = arith.constant 0.000000e+00 : f32
    %307 = vector.broadcast %cst_58 : f32 to vector<2x32xf32>
    %308 = arith.subf %307, %306 : vector<2x32xf32>
    %309 = math.exp %308 : vector<2x32xf32>
    %cst_59 = arith.constant 1.000000e+00 : f32
    %310 = vector.broadcast %cst_59 : f32 to vector<2x32xf32>
    %311 = arith.addf %310, %309 : vector<2x32xf32>
    %312 = tpu.reciprocal %311 {approx = true} : vector<2x32xf32> -> vector<2x32xf32>
    %313 = vector.extract_strided_slice %300 {offsets = [0, 32], sizes = [2, 32], strides = [1, 1]} : vector<2x96xf32> to vector<2x32xf32>
    %314 = vector.extract_strided_slice %303 {offsets = [0, 32], sizes = [2, 32], strides = [1, 1]} : vector<2x96xf32> to vector<2x32xf32>
    %315 = arith.addf %313, %314 : vector<2x32xf32>
    %cst_60 = arith.constant 0.000000e+00 : f32
    %316 = vector.broadcast %cst_60 : f32 to vector<2x32xf32>
    %317 = arith.subf %316, %315 : vector<2x32xf32>
    %318 = math.exp %317 : vector<2x32xf32>
    %cst_61 = arith.constant 1.000000e+00 : f32
    %319 = vector.broadcast %cst_61 : f32 to vector<2x32xf32>
    %320 = arith.addf %319, %318 : vector<2x32xf32>
    %321 = tpu.reciprocal %320 {approx = true} : vector<2x32xf32> -> vector<2x32xf32>
    %322 = vector.extract_strided_slice %300 {offsets = [0, 64], sizes = [2, 32], strides = [1, 1]} : vector<2x96xf32> to vector<2x32xf32>
    %323 = vector.extract_strided_slice %303 {offsets = [0, 64], sizes = [2, 32], strides = [1, 1]} : vector<2x96xf32> to vector<2x32xf32>
    %324 = arith.mulf %312, %323 : vector<2x32xf32>
    %325 = arith.addf %322, %324 : vector<2x32xf32>
    %326 = math.tanh %325 : vector<2x32xf32>
    %cst_62 = arith.constant 1.000000e+00 : f32
    %327 = vector.broadcast %cst_62 : f32 to vector<2x32xf32>
    %328 = arith.subf %327, %321 : vector<2x32xf32>
    %329 = arith.mulf %328, %326 : vector<2x32xf32>
    %330 = arith.mulf %321, %294 : vector<2x32xf32>
    %331 = arith.addf %329, %330 : vector<2x32xf32>
    %c7_i32 = arith.constant 7 : i32
    %332 = vector.broadcast %c7_i32 : i32 to vector<2x1xi32>
    %333 = arith.cmpi sgt, %0, %332 : vector<2x1xi32>
    %334 = vector.shape_cast %333 : vector<2x1xi1> to vector<2x1xi1>
    %335 = vector.broadcast %334 : vector<2x1xi1> to vector<2x32xi1>
    %336 = arith.select %335, %331, %294 : vector<2x32xi1>, vector<2x32xf32>
    %cst_63 = arith.constant 0.000000e+00 : f32
    %337 = vector.shape_cast %333 : vector<2x1xi1> to vector<2x1xi1>
    %338 = vector.broadcast %337 : vector<2x1xi1> to vector<2x32xi1>
    %339 = vector.broadcast %cst_63 : f32 to vector<2x32xf32>
    %340 = arith.select %338, %331, %339 : vector<2x32xi1>, vector<2x32xf32>
    %341 = tpu.concatenate %46, %88, %130, %172, %214, %256, %298, %340 in 1 : vector<2x32xf32>, vector<2x32xf32>, vector<2x32xf32>, vector<2x32xf32>, vector<2x32xf32>, vector<2x32xf32>, vector<2x32xf32>, vector<2x32xf32> -> vector<2x256xf32>
    %c0_64 = arith.constant 0 : index
    %c0_65 = arith.constant 0 : index
    %342 = vector.load %arg4[%c0_64, %c0_65] : memref<2x256xf32, #tpu.memory_space<vmem>>, vector<2x256xf32>
    tpu.vector_store %arg4[%c0_64, %c0_65], %341 {strides = array<i32>} : memref<2x256xf32, #tpu.memory_space<vmem>>, vector<2x256xf32>,
    %c0_66 = arith.constant 0 : index
    %c0_67 = arith.constant 0 : index
    %343 = vector.load %arg5[%c0_66, %c0_67] : memref<2x32xf32, #tpu.memory_space<vmem>>, vector<2x32xf32>
    tpu.vector_store %arg5[%c0_66, %c0_67], %336 {strides = array<i32>} : memref<2x32xf32, #tpu.memory_space<vmem>>, vector<2x32xf32>,
    return
  }
}

</mosaic_0001>

<bundles_post_ra>
// kernel: tpu_custom_call.1
= control target key start
LH: loop header
LB: loop body
LE: loop exit
PB: predicated region body
PF: predicated region fallthrough
CT: control target
= control target key end

     0   :  { %11 = vsyncpa [#allocation3], 0  ;;  %s1608_s0 = inlined_call_operand.vmem [shape: s32[2,1], index: 0, kind: input, shape index: {}]   ;;  %s1609_s1 = inlined_call_operand.hbm [shape: f32[8,2,96], index: 1, kind: input, shape index: {}]   ;;  %s1610_s2 = inlined_call_operand.hbm [shape: f32[32,96], index: 2, kind: input, shape index: {}]   ;;  %s1611_s3 = inlined_call_operand.vmem [shape: f32[1,96], index: 3, kind: input, shape index: {}]   ;;  %s1612_s4 = inlined_call_operand.hbm [shape: f32[2,256], index: 4, kind: output, shape index: {0}]   ;;  %s1613_s5 = inlined_call_operand.hbm [shape: f32[2,32], index: 5, kind: output, shape index: {1}]  }
   0x1   :  { %12 = vsyncpa [#allocation6], 0 }
   0x2   :  { %13 = vsyncpa [#allocation4], 0 }
   0x3   :  { %14 = vsyncpa [#allocation9], 0  ;;  %s1353_s18 = smov [#allocation2]   ;;  %s1257_s22 = scalar_lea.hbm %s1609_s1, 256 }
   0x4   :  { %s22_s19 = sshll.u32 %s1353_s18, 4  ;;  %p1258_p0 = scmp.ne.s32.totalorder %s1609_s1, %s1257_s22  ;;  %s23_s19 = int_to_ptr.vmem [resolvable:$true] %s22_s19 }
   0x5   :  { %p1261_p1 = scmp.lt.u32.totalorder %s1257_s22, %s1609_s1 }
   0x7   :  { %p1263_p2 = pnand %p1261_p1, %p1258_p0 }
   0x9   :  { %1266 = shalt.err (!%p1263_p2)
}
   0xa   :  { %s1267_s27 = scalar_lea.vmem %s23_s19, 256  ;;  %p1272_p4 = scmp.lt.s32.totalorder %s23_s19, %s23_s19 }
   0xb   :  { %p1268_p3 = scmp.ne.s32.totalorder %s23_s19, %s1267_s27  ;;  %p1273_p5 = scmp.lt.s32.totalorder %s1267_s27, %s1267_s27 }
   0xd   :  { %p1274_p6 = por %p1273_p5, %p1272_p4 }
   0xf   :  { %p1275_p7 = pnand %p1274_p6, %p1268_p3 }
  0x11   :  { %1278 = shalt.err (!%p1275_p7)
}
  0x12   :  { %s1354_s28 = smov 32   ;;  %s1355_s29 = smov 2  }
  0x13   :  { %28 = dma.hbm_to_vmem [thread:$0]  %s1609_s1, 256, %s23_s19, [#allocation3], %s1354_s28, %s1354_s28, %s1355_s29  }
  0x14   :  { %s1356_s7 = smov [#allocation5]   ;;  %s1279_s11 = scalar_lea.hbm %s1610_s2, 512 }
  0x15   :  { %s34_s8 = sshll.u32 %s1356_s7, 4  ;;  %p1280_p8 = scmp.ne.s32.totalorder %s1610_s2, %s1279_s11  ;;  %s35_s8 = int_to_ptr.vmem [resolvable:$true] %s34_s8 }
  0x16   :  { %p1283_p9 = scmp.lt.u32.totalorder %s1279_s11, %s1610_s2 }
  0x18   :  { %p1285_p10 = pnand %p1283_p9, %p1280_p8 }
  0x1a   :  { %1288 = shalt.err (!%p1285_p10)
}
  0x1b   :  { %s1289_s16 = scalar_lea.vmem %s35_s8, 512  ;;  %p1294_p12 = scmp.lt.s32.totalorder %s35_s8, %s35_s8 }
  0x1c   :  { %p1290_p11 = scmp.ne.s32.totalorder %s35_s8, %s1289_s16  ;;  %p1295_p13 = scmp.lt.s32.totalorder %s1289_s16, %s1289_s16 }
  0x1e   :  { %p1296_p0 = por %p1295_p13, %p1294_p12 }
  0x20   :  { %p1297_p1 = pnand %p1296_p0, %p1290_p11 }
  0x22   :  { %1300 = shalt.err (!%p1297_p1)
}
  0x23   :  { %s1357_s1 = smov 128   ;;  %s1358_s17 = smov 8  }
  0x24   :  { %40 = dma.hbm_to_vmem [thread:$0]  %s1610_s2, 512, %s35_s8, [#allocation6], %s1357_s1, %s1357_s1, %s1358_s17  }
  0x25   :  { %1345 = dma.done.wait [#allocation3], 256  }
  0x26   :  { %1346 = vsyncadd [#allocation3], 4294967040 }
  0x27   :  { %1347 = dma.done.wait [#allocation6], 512  }
  0x28   :  { %1348 = vsyncadd [#allocation6], 4294966784  ;;  %v1359_v0 = vmov 0.0|0.0   ;;  %vm1360_vm0 = vmmov 0   ;;  %v1361_v1 = vmov 0.0   ;;  %v50_v2 = vld [vmem:[#allocation5] sm:$0xff] }
  0x29   :  { %1145 = vmatprep.subr.bf16.mxu0 %v1359_v0  ;;  %1065 = vmatprep.mubr.msk.f32.mxu0 %vm1360_vm0, %v1361_v1  ;;  %v51_v3 = vld [vmem:[#allocation5 + $0x8] sm:$0xff]  ;;  %v52_v4 = vld [vmem:[#allocation5 + $0x10] sm:$0xff]  ;;  %v53_v6 = vld [vmem:[#allocation5 + $0x18] sm:$0xff]  ;;  %v1362_v9 = vmov 0   ;;  %vm69_vm3 = vcmask 261120   ;;  %s1365_s23 = smov [#allocation8]  }
  0x2a   :  { %1151 = vmatprep.subr.bf16.mxu1 %v1359_v0  ;;  %1076 = vmatprep.mubr.msk.f32.mxu1 %vm1360_vm0, %v1361_v1  ;;  %v1429_v5 = vpack.c.bf16 %v51_v3, %v50_v2  ;;  %v1432_v7 = vpack.c.bf16 %v53_v6, %v52_v4  ;;  %v1451_v8 = vld [vmem:[%s1608_s0] sm:$0x3]  ;;  %s1363_s0 = smov 64   ;;  %v55_v15 = vld [vmem:[#allocation2] sm:$0x3]  ;;  %s994_s24 = sshll.u32 %s1365_s23, 4  ;;  %s995_s24 = int_to_ptr.vmem [resolvable:$true] %s994_s24 }
  0x2b   :  { %1207 = vset.pattern.permute.xlu1 %v1362_v9  ;;  %vm168_vm1 = vcmp.gt.s32.totalorder %v1451_v8, 0  ;;  %1208 = vset.pattern.permute.xlu0 %v1362_v9  ;;  %v1460_v11 = vld [vmem:[%s1611_s3] ss:$0 sm:$0xff]  ;;  %s1364_s3 = smov 96   ;;  %vm275_vm4 = vcmp.gt.s32.totalorder %v1451_v8, 1  ;;  %vm383_vm6 = vcmp.gt.s32.totalorder %v1451_v8, 2  ;;  %p1306_p3 = scmp.lt.s32.totalorder %s995_s24, %s995_s24 }
  0x2c   :  { %1147 = vmatpush3.bf16.msra.mxu0 %v1429_v5  ;;  %1153 = vmatpush3.bf16.msra.mxu1 %v1429_v5  ;;  %v169_v10 = vsel %vm168_vm1, 1, %v1362_v9  ;;  %v276_v38 = vsel %vm275_vm4, 1, %v1362_v9  ;;  %v56_v39 = vld [vmem:[#allocation2 + $0x2] sm:$0x3]  ;;  %v57_v63 = vld [vmem:[#allocation2 + $0x4] sm:$0x3] }
  0x2d   :  { %1148 = vmatprep.subr.bf16.mxu0 %v1359_v0  ;;  %1154 = vmatprep.subr.bf16.mxu1 %v1359_v0  ;;  %vm491_vm8 = vcmp.gt.s32.totalorder %v1451_v8, 3  ;;  %vm599_vm10 = vcmp.gt.s32.totalorder %v1451_v8, 4  ;;  %vm707_vm12 = vcmp.gt.s32.totalorder %v1451_v8, 5  ;;  %vm815_vm14 = vcmp.gt.s32.totalorder %v1451_v8, 6  ;;  %s1366_s25 = smov [#allocation7]   ;;  %s1301_s27 = scalar_lea.vmem %s995_s24, 32 }
  0x2e   :  { %171 = vperm.xlu1 %1207, %v169_v10   ;;  %vm955_vm4 = vcmask 785408   ;;  %s984_s26 = sshll.u32 %s1366_s25, 4  ;;  %p1302_p2 = scmp.ne.s32.totalorder %s995_s24, %s1301_s27  ;;  %s1577_s26 = int_to_ptr.vmem [resolvable:$true] %s984_s26 }
  0x2f   :  { %p1307_p4 = scmp.lt.s32.totalorder %s1301_s27, %s1301_s27 }
  0x30   :  { %1150 = vmatpush3.bf16.msra.mxu0 %v1432_v7  ;;  %1156 = vmatpush3.bf16.msra.mxu1 %v1432_v7 }
  0x31   :  { %1157 = vmatprep.subr.bf16.mxu0 %v1359_v0  ;;  %1163 = vmatprep.subr.bf16.mxu1 %v1359_v0  ;;  %p1308_p5 = por %p1307_p4, %p1306_p3 }
  0x33   :  { %1066 = vmatmul.mubr.f32.vlgmr.msra.gmra.mrb[0].mxu0 %v1361_v1  ;;  %p1309_p6 = pnand %p1308_p5, %p1302_p2 }
  0x34   :  { %1159 = vmatpush3.bf16.msra.mxu0 %v1429_v5  ;;  %1087 = vmatprep.mubr.msk.f32.mxu0 %vm1360_vm0, %v1361_v1 }
  0x35   :  { %1160 = vmatprep.subr.bf16.mxu0 %v1359_v0 }
  0x38   :  { %1162 = vmatpush3.bf16.msra.mxu0 %v1432_v7 }
  0x39   :  { %1169 = vmatprep.subr.bf16.mxu0 %v1359_v0 }
  0xad   :  { %v172_v27 = vpop.permute.xlu1 %171 }
  0xae   :  { %vm173_vm2 = vcmp.eq.s32.totalorder %v172_v27, 1 }
 0x106   :  { %v139_v12 = vpop.f32.mrb[0].mxu0 }
 0x107   :  { %v140_v13 = vadd.f32 %v1460_v11, %v139_v12  ;;  %v1067_v14 = vpop.f32.mrb[1].mxu0  ;;  %v384_v12 = vsel %vm383_vm6, 1, %v1362_v9 }
 0x109   :  { %150 = vrot.lane.b32.xlu0 %v140_v13, %s1363_s0  ;;  %v143_v16 = vadd.f32 %v140_v13, %v55_v15 }
 0x10b   :  { %v144_v17 = vsub.f32 0.0, %v143_v16 }
 0x10d   :  { %v145_v18 = vmul.f32 1.442695, %v144_v17 }
 0x10f   :  { %1209 = vpow2.f32 %v145_v18 }
 0x119   :  { %v1210_v19 = vpop.eup %1209 }
 0x11a   :  { %v147_v20 = vadd.f32 1.0, %v1210_v19 }
 0x11c   :  { %1211 = vrcp.f32 %v147_v20 }
 0x126   :  { %v1212_v21 = vpop.eup %1211 }
 0x127   :  { %v160_v28 = vsub.f32 1.0, %v1212_v21  ;;  %v166_v30 = vmul.f32 0.0, %v1212_v21 }
 0x17b   :  { %v151_v22 = vpop.permute.xlu0 %150 }
 0x17c   :  { %v153_v23 = vmul.f32 %v1212_v21, %v151_v22 }
 0x17e   :  { %155 = vrot.lane.b32.xlu0 %v153_v23, %s1363_s0 }
 0x1f0   :  { %v156_v24 = vpop.permute.xlu0 %155 }
 0x1f1   :  { %v158_v25 = vadd.f32 %v156_v24, %v55_v15 }
 0x1f3   :  { %1213 = vtanh.f32 %v158_v25 }
 0x1fd   :  { %v1214_v26 = vpop.eup %1213 }
 0x1fe   :  { %162 = vrot.lane.b32.xlu1 %v1214_v26, %s1364_s3 }
 0x270   :  { %v163_v29 = vpop.permute.xlu1 %162 }
 0x271   :  { %v165_v31 = vmul.f32 %v163_v29, %v160_v28 }
 0x273   :  { %v167_v32 = vadd.f32 %v166_v30, %v165_v31  ;;  %v492_v31 = vsel %vm491_vm8, 1, %v1362_v9 }
 0x275   :  { %v174_v33 = vsel %vm173_vm2, %v167_v32, 0.0  ;;  %v58_v32 = vld [vmem:[#allocation2 + $0x6] sm:$0x3]  ;;  %vm953_vm2 = vcmask 523264  }
 0x276   :  { %176 = vrot.lane.b32.xlu0 %v174_v33, %s1364_s3 }
 0x2e8   :  { %v1467_v34 = vpop.permute.xlu0 %176 }
 0x2e9   :  { %1077 = vmatmul.mubr.msk.f32.vlgmr.msra.gmra.mrb[0].mxu1 %vm69_vm3, %v1467_v34 }
 0x2ea   :  { %1165 = vmatpush3.bf16.msra.mxu1 %v1429_v5  ;;  %1098 = vmatprep.mubr.msk.f32.mxu1 %vm1360_vm0, %v1361_v1 }
 0x2eb   :  { %1166 = vmatprep.subr.bf16.mxu1 %v1359_v0 }
 0x2ee   :  { %1168 = vmatpush3.bf16.msra.mxu1 %v1432_v7 }
 0x2ef   :  { %1175 = vmatprep.subr.bf16.mxu1 %v1359_v0 }
 0x3bc   :  { %v246_v35 = vpop.f32.mrb[0].mxu1 }
 0x3bd   :  { %v247_v36 = vadd.f32 %v1460_v11, %v246_v35  ;;  %v1078_v37 = vpop.f32.mrb[1].mxu1 }
 0x3bf   :  { %257 = vrot.lane.b32.xlu1 %v247_v36, %s1363_s0  ;;  %v250_v40 = vadd.f32 %v247_v36, %v56_v39 }
 0x3c1   :  { %v251_v41 = vsub.f32 0.0, %v250_v40 }
 0x3c3   :  { %278 = vperm.xlu1 %1207, %v276_v38   ;;  %v252_v42 = vmul.f32 1.442695, %v251_v41 }
 0x3c5   :  { %1215 = vpow2.f32 %v252_v42 }
 0x3cf   :  { %v1216_v43 = vpop.eup %1215 }
 0x3d0   :  { %v254_v44 = vadd.f32 1.0, %v1216_v43 }
 0x3d2   :  { %1217 = vrcp.f32 %v254_v44 }
 0x3dc   :  { %v1218_v45 = vpop.eup %1217 }
 0x3dd   :  { %v267_v51 = vsub.f32 1.0, %v1218_v45  ;;  %v273_v54 = vmul.f32 %v1218_v45, %v174_v33 }
 0x431   :  { %v258_v46 = vpop.permute.xlu1 %257 }
 0x432   :  { %v260_v47 = vmul.f32 %v1218_v45, %v258_v46 }
 0x434   :  { %262 = vrot.lane.b32.xlu0 %v260_v47, %s1363_s0 }
 0x442   :  { %v279_v53 = vpop.permute.xlu1 %278 }
 0x443   :  { %vm280_vm5 = vcmp.eq.s32.totalorder %v279_v53, 1 }
 0x4a6   :  { %v263_v48 = vpop.permute.xlu0 %262 }
 0x4a7   :  { %v265_v49 = vadd.f32 %v263_v48, %v56_v39 }
 0x4a9   :  { %1219 = vtanh.f32 %v265_v49 }
 0x4b3   :  { %v1220_v50 = vpop.eup %1219 }
 0x4b4   :  { %269 = vrot.lane.b32.xlu0 %v1220_v50, %s1364_s3 }
 0x526   :  { %v270_v52 = vpop.permute.xlu0 %269 }
 0x527   :  { %v272_v55 = vmul.f32 %v270_v52, %v267_v51 }
 0x529   :  { %v274_v56 = vadd.f32 %v273_v54, %v272_v55 }
 0x52b   :  { %v1483_v57 = vsel %vm280_vm5, %v274_v56, 0.0  ;;  %v281_v58 = vsel %vm280_vm5, %v274_v56, %v174_v33  ;;  %vm976_vm5 = vcmask 254976  }
 0x52c   :  { %284 = vrot.lane.b32.xlu1 %v281_v58, %s1364_s3 }
 0x59e   :  { %v285_v59 = vpop.permute.xlu1 %284 }
 0x59f   :  { %1088 = vmatmul.mubr.msk.f32.vlgmr.msra.gmra.mrb[2].mxu0 %vm69_vm3, %v285_v59  ;;  %v59_v59 = vld [vmem:[#allocation2 + $0x8] sm:$0x3] }
 0x5a0   :  { %1171 = vmatpush3.bf16.msra.mxu0 %v1429_v5  ;;  %1109 = vmatprep.mubr.msk.f32.mxu0 %vm1360_vm0, %v1361_v1 }
 0x5a1   :  { %1172 = vmatprep.subr.bf16.mxu0 %v1359_v0 }
 0x5a4   :  { %1174 = vmatpush3.bf16.msra.mxu0 %v1432_v7 }
 0x5a5   :  { %1181 = vmatprep.subr.bf16.mxu0 %v1359_v0 }
 0x672   :  { %v354_v60 = vpop.f32.mrb[2].mxu0 }
 0x673   :  { %v355_v61 = vadd.f32 %v1460_v11, %v354_v60  ;;  %v1089_v62 = vpop.f32.mrb[3].mxu0 }
 0x675   :  { %365 = vrot.lane.b32.xlu0 %v355_v61, %s1363_s0  ;;  %v358_v2 = vadd.f32 %v355_v61, %v57_v63 }
 0x677   :  { %v359_v3 = vsub.f32 0.0, %v358_v2 }
 0x679   :  { %v360_v4 = vmul.f32 1.442695, %v359_v3  ;;  %386 = vperm.xlu0 %1208, %v384_v12  }
 0x67b   :  { %1221 = vpow2.f32 %v360_v4 }
 0x685   :  { %v1222_v6 = vpop.eup %1221 }
 0x686   :  { %v362_v10 = vadd.f32 1.0, %v1222_v6 }
 0x688   :  { %1223 = vrcp.f32 %v362_v10 }
 0x692   :  { %v1224_v13 = vpop.eup %1223 }
 0x693   :  { %v375_v19 = vsub.f32 1.0, %v1224_v13  ;;  %v381_v22 = vmul.f32 %v1224_v13, %v281_v58 }
 0x6e7   :  { %v366_v14 = vpop.permute.xlu0 %365 }
 0x6e8   :  { %v368_v15 = vmul.f32 %v1224_v13, %v366_v14 }
 0x6ea   :  { %370 = vrot.lane.b32.xlu1 %v368_v15, %s1363_s0 }
 0x6f8   :  { %v387_v20 = vpop.permute.xlu0 %386 }
 0x6f9   :  { %vm388_vm7 = vcmp.eq.s32.totalorder %v387_v20, 1 }
 0x75c   :  { %v371_v16 = vpop.permute.xlu1 %370 }
 0x75d   :  { %v373_v17 = vadd.f32 %v371_v16, %v57_v63 }
 0x75f   :  { %1225 = vtanh.f32 %v373_v17 }
 0x769   :  { %v1226_v18 = vpop.eup %1225 }
 0x76a   :  { %377 = vrot.lane.b32.xlu1 %v1226_v18, %s1364_s3 }
 0x7dc   :  { %v378_v21 = vpop.permute.xlu1 %377 }
 0x7dd   :  { %v380_v23 = vmul.f32 %v378_v21, %v375_v19 }
 0x7df   :  { %v382_v24 = vadd.f32 %v381_v22, %v380_v23 }
 0x7e1   :  { %v389_v25 = vsel %vm388_vm7, %v382_v24, %v281_v58  ;;  %v1499_v26 = vsel %vm388_vm7, %v382_v24, 0.0  ;;  %v600_v58 = vsel %vm599_vm10, 1, %v1362_v9 }
 0x7e2   :  { %392 = vrot.lane.b32.xlu1 %v389_v25, %s1364_s3 }
 0x854   :  { %v393_v27 = vpop.permute.xlu1 %392 }
 0x855   :  { %1099 = vmatmul.mubr.msk.f32.vlgmr.msra.gmra.mrb[2].mxu1 %vm69_vm3, %v393_v27  ;;  %v708_v27 = vsel %vm707_vm12, 1, %v1362_v9 }
 0x856   :  { %1177 = vmatpush3.bf16.msra.mxu1 %v1429_v5  ;;  %1120 = vmatprep.mubr.msk.f32.mxu1 %vm1360_vm0, %v1361_v1 }
 0x857   :  { %1178 = vmatprep.subr.bf16.mxu1 %v1359_v0 }
 0x85a   :  { %1180 = vmatpush3.bf16.msra.mxu1 %v1432_v7 }
 0x85b   :  { %1187 = vmatprep.subr.bf16.mxu1 %v1359_v0 }
 0x928   :  { %v462_v28 = vpop.f32.mrb[2].mxu1 }
 0x929   :  { %v463_v29 = vadd.f32 %v1460_v11, %v462_v28  ;;  %v1100_v30 = vpop.f32.mrb[3].mxu1  ;;  %v60_v28 = vld [vmem:[#allocation2 + $0xa] sm:$0x3] }
 0x92b   :  { %473 = vrot.lane.b32.xlu0 %v463_v29, %s1363_s0  ;;  %v466_v33 = vadd.f32 %v463_v29, %v58_v32 }
 0x92d   :  { %v467_v35 = vsub.f32 0.0, %v466_v33 }
 0x92f   :  { %494 = vperm.xlu0 %1208, %v492_v31   ;;  %v468_v36 = vmul.f32 1.442695, %v467_v35 }
 0x931   :  { %1227 = vpow2.f32 %v468_v36 }
 0x93b   :  { %v1228_v37 = vpop.eup %1227 }
 0x93c   :  { %v470_v38 = vadd.f32 1.0, %v1228_v37 }
 0x93e   :  { %1229 = vrcp.f32 %v470_v38 }
 0x948   :  { %v1230_v39 = vpop.eup %1229 }
 0x949   :  { %v483_v45 = vsub.f32 1.0, %v1230_v39  ;;  %v489_v48 = vmul.f32 %v1230_v39, %v389_v25 }
 0x99d   :  { %v474_v40 = vpop.permute.xlu0 %473 }
 0x99e   :  { %v476_v41 = vmul.f32 %v1230_v39, %v474_v40 }
 0x9a0   :  { %478 = vrot.lane.b32.xlu1 %v476_v41, %s1363_s0 }
 0x9ae   :  { %v495_v47 = vpop.permute.xlu0 %494 }
 0x9af   :  { %vm496_vm9 = vcmp.eq.s32.totalorder %v495_v47, 1 }
 0xa12   :  { %v479_v42 = vpop.permute.xlu1 %478 }
 0xa13   :  { %v481_v43 = vadd.f32 %v479_v42, %v58_v32 }
 0xa15   :  { %1231 = vtanh.f32 %v481_v43 }
 0xa1f   :  { %v1232_v44 = vpop.eup %1231 }
 0xa20   :  { %485 = vrot.lane.b32.xlu1 %v1232_v44, %s1364_s3 }
 0xa92   :  { %v486_v46 = vpop.permute.xlu1 %485 }
 0xa93   :  { %v488_v49 = vmul.f32 %v486_v46, %v483_v45 }
 0xa95   :  { %v490_v50 = vadd.f32 %v489_v48, %v488_v49  ;;  %v816_v49 = vsel %vm815_vm14, 1, %v1362_v9 }
 0xa97   :  { %v497_v51 = vsel %vm496_vm9, %v490_v50, %v389_v25  ;;  %v1515_v52 = vsel %vm496_vm9, %v490_v50, 0.0  ;;  %v61_v50 = vld [vmem:[#allocation2 + $0xc] sm:$0x3] }
 0xa98   :  { %500 = vrot.lane.b32.xlu0 %v497_v51, %s1364_s3 }
 0xb0a   :  { %v501_v53 = vpop.permute.xlu0 %500 }
 0xb0b   :  { %1110 = vmatmul.mubr.msk.f32.vlgmr.msra.gmra.mrb[4].mxu0 %vm69_vm3, %v501_v53 }
 0xb0c   :  { %1183 = vmatpush3.bf16.msra.mxu0 %v1429_v5  ;;  %1131 = vmatprep.mubr.msk.f32.mxu0 %vm1360_vm0, %v1361_v1 }
 0xb0d   :  { %1184 = vmatprep.subr.bf16.mxu0 %v1359_v0 }
 0xb10   :  { %1186 = vmatpush3.bf16.msra.mxu0 %v1432_v7 }
 0xbde   :  { %v570_v54 = vpop.f32.mrb[4].mxu0 }
 0xbdf   :  { %v571_v55 = vadd.f32 %v1460_v11, %v570_v54  ;;  %v1111_v56 = vpop.f32.mrb[5].mxu0 }
 0xbe1   :  { %581 = vrot.lane.b32.xlu1 %v571_v55, %s1363_s0  ;;  %v574_v60 = vadd.f32 %v571_v55, %v59_v59 }
 0xbe3   :  { %v575_v61 = vsub.f32 0.0, %v574_v60 }
 0xbe5   :  { %602 = vperm.xlu1 %1207, %v600_v58   ;;  %v576_v62 = vmul.f32 1.442695, %v575_v61 }
 0xbe7   :  { %1233 = vpow2.f32 %v576_v62 }
 0xbf1   :  { %v1234_v63 = vpop.eup %1233 }
 0xbf2   :  { %v578_v2 = vadd.f32 1.0, %v1234_v63 }
 0xbf4   :  { %1235 = vrcp.f32 %v578_v2 }
 0xbfe   :  { %v1236_v3 = vpop.eup %1235 }
 0xbff   :  { %v591_v14 = vsub.f32 1.0, %v1236_v3  ;;  %v597_v17 = vmul.f32 %v1236_v3, %v497_v51 }
 0xc53   :  { %v582_v4 = vpop.permute.xlu1 %581 }
 0xc54   :  { %v584_v6 = vmul.f32 %v1236_v3, %v582_v4 }
 0xc56   :  { %586 = vrot.lane.b32.xlu0 %v584_v6, %s1363_s0 }
 0xc64   :  { %v603_v16 = vpop.permute.xlu1 %602 }
 0xc65   :  { %vm604_vm11 = vcmp.eq.s32.totalorder %v603_v16, 1 }
 0xcc8   :  { %v587_v10 = vpop.permute.xlu0 %586 }
 0xcc9   :  { %v589_v12 = vadd.f32 %v587_v10, %v59_v59 }
 0xccb   :  { %1237 = vtanh.f32 %v589_v12 }
 0xcd5   :  { %v1238_v13 = vpop.eup %1237 }
 0xcd6   :  { %593 = vrot.lane.b32.xlu0 %v1238_v13, %s1364_s3 }
 0xd48   :  { %v594_v15 = vpop.permute.xlu0 %593 }
 0xd49   :  { %v596_v18 = vmul.f32 %v594_v15, %v591_v14 }
 0xd4b   :  { %v598_v19 = vadd.f32 %v597_v17, %v596_v18 }
 0xd4d   :  { %v605_v20 = vsel %vm604_vm11, %v598_v19, %v497_v51  ;;  %v1530_v21 = vsel %vm604_vm11, %v598_v19, 0.0 }
 0xd4e   :  { %608 = vrot.lane.b32.xlu1 %v605_v20, %s1364_s3 }
 0xdc0   :  { %v609_v22 = vpop.permute.xlu1 %608 }
 0xdc1   :  { %1121 = vmatmul.mubr.msk.f32.vlgmr.msra.gmra.mrb[4].mxu1 %vm69_vm3, %v609_v22 }
 0xdc2   :  { %1189 = vmatpush3.bf16.msra.mxu1 %v1429_v5  ;;  %1142 = vmatprep.mubr.msk.f32.mxu1 %vm1360_vm0, %v1361_v1  ;;  %vm923_vm0 = vcmp.gt.s32.totalorder %v1451_v8, 7 }
 0xdc3   :  { %1190 = vmatprep.subr.bf16.mxu1 %v1359_v0  ;;  %v924_v19 = vsel %vm923_vm0, 1, %v1362_v9 }
 0xdc6   :  { %1192 = vmatpush3.bf16.msra.mxu1 %v1432_v7 }
 0xe94   :  { %v678_v23 = vpop.f32.mrb[4].mxu1 }
 0xe95   :  { %v679_v24 = vadd.f32 %v1460_v11, %v678_v23  ;;  %v1122_v25 = vpop.f32.mrb[5].mxu1 }
 0xe97   :  { %689 = vrot.lane.b32.xlu0 %v679_v24, %s1363_s0  ;;  %v682_v5 = vadd.f32 %v679_v24, %v60_v28 }
 0xe99   :  { %v683_v29 = vsub.f32 0.0, %v682_v5 }
 0xe9b   :  { %710 = vperm.xlu0 %1208, %v708_v27   ;;  %v684_v30 = vmul.f32 1.442695, %v683_v29 }
 0xe9d   :  { %1239 = vpow2.f32 %v684_v30 }
 0xea7   :  { %v1240_v1 = vpop.eup %1239 }
 0xea8   :  { %v686_v0 = vadd.f32 1.0, %v1240_v1 }
 0xeaa   :  { %1241 = vrcp.f32 %v686_v0 }
 0xeb4   :  { %v1242_v7 = vpop.eup %1241 }
 0xeb5   :  { %v699_v37 = vsub.f32 1.0, %v1242_v7  ;;  %v705_v40 = vmul.f32 %v1242_v7, %v605_v20 }
 0xf09   :  { %v690_v31 = vpop.permute.xlu0 %689 }
 0xf0a   :  { %v692_v32 = vmul.f32 %v1242_v7, %v690_v31 }
 0xf0c   :  { %694 = vrot.lane.b32.xlu1 %v692_v32, %s1363_s0 }
 0xf1a   :  { %v711_v39 = vpop.permute.xlu0 %710 }
 0xf1b   :  { %vm712_vm13 = vcmp.eq.s32.totalorder %v711_v39, 1 }
 0xf7e   :  { %v695_v33 = vpop.permute.xlu1 %694 }
 0xf7f   :  { %v697_v35 = vadd.f32 %v695_v33, %v60_v28 }
 0xf81   :  { %1243 = vtanh.f32 %v697_v35 }
 0xf8b   :  { %v1244_v36 = vpop.eup %1243 }
 0xf8c   :  { %701 = vrot.lane.b32.xlu1 %v1244_v36, %s1364_s3 }
 0xffe   :  { %v702_v38 = vpop.permute.xlu1 %701 }
 0xfff   :  { %v704_v41 = vmul.f32 %v702_v38, %v699_v37  ;;  %v952_v38 = vsel %vm69_vm3, %v1467_v34, %v1483_v57 }
0x1001   :  { %v706_v42 = vadd.f32 %v705_v40, %v704_v41 }
0x1003   :  { %v713_v43 = vsel %vm712_vm13, %v706_v42, %v605_v20  ;;  %v1545_v44 = vsel %vm712_vm13, %v706_v42, 0.0  ;;  %v62_v20 = vld [vmem:[#allocation2 + $0xe] sm:$0x3] }
0x1004   :  { %716 = vrot.lane.b32.xlu0 %v713_v43, %s1364_s3 }
0x1076   :  { %v717_v45 = vpop.permute.xlu0 %716 }
0x1077   :  { %1132 = vmatmul.mubr.msk.f32.vlgmr.msra.gmra.mrb[6].mxu0 %vm69_vm3, %v717_v45 }
0x114a   :  { %v786_v46 = vpop.f32.mrb[6].mxu0 }
0x114b   :  { %v787_v47 = vadd.f32 %v1460_v11, %v786_v46  ;;  %v1133_v48 = vpop.f32.mrb[7].mxu0 }
0x114d   :  { %797 = vrot.lane.b32.xlu1 %v787_v47, %s1363_s0  ;;  %v790_v51 = vadd.f32 %v787_v47, %v61_v50 }
0x114f   :  { %v791_v53 = vsub.f32 0.0, %v790_v51 }
0x1151   :  { %818 = vperm.xlu1 %1207, %v816_v49   ;;  %v792_v54 = vmul.f32 1.442695, %v791_v53 }
0x1153   :  { %1245 = vpow2.f32 %v792_v54 }
0x115d   :  { %v1246_v55 = vpop.eup %1245 }
0x115e   :  { %v794_v56 = vadd.f32 1.0, %v1246_v55 }
0x1160   :  { %1247 = vrcp.f32 %v794_v56 }
0x116a   :  { %v1248_v58 = vpop.eup %1247 }
0x116b   :  { %v807_v2 = vsub.f32 1.0, %v1248_v58  ;;  %v813_v6 = vmul.f32 %v1248_v58, %v713_v43 }
0x11bf   :  { %v798_v59 = vpop.permute.xlu1 %797 }
0x11c0   :  { %v800_v60 = vmul.f32 %v1248_v58, %v798_v59 }
0x11c2   :  { %802 = vrot.lane.b32.xlu0 %v800_v60, %s1363_s0 }
0x11d0   :  { %v819_v4 = vpop.permute.xlu1 %818 }
0x11d1   :  { %vm820_vm15 = vcmp.eq.s32.totalorder %v819_v4, 1 }
0x1234   :  { %v803_v61 = vpop.permute.xlu0 %802 }
0x1235   :  { %v805_v62 = vadd.f32 %v803_v61, %v61_v50 }
0x1237   :  { %1249 = vtanh.f32 %v805_v62 }
0x1241   :  { %v1250_v63 = vpop.eup %1249 }
0x1242   :  { %809 = vrot.lane.b32.xlu0 %v1250_v63, %s1364_s3 }
0x12b4   :  { %v810_v3 = vpop.permute.xlu0 %809 }
0x12b5   :  { %v812_v10 = vmul.f32 %v810_v3, %v807_v2 }
0x12b7   :  { %v814_v12 = vadd.f32 %v813_v6, %v812_v10 }
0x12b9   :  { %v821_v13 = vsel %vm820_vm15, %v814_v12, %v713_v43  ;;  %v822_v14 = vsel %vm820_vm15, %v814_v12, 0.0 }
0x12ba   :  { %824 = vrot.lane.b32.xlu1 %v821_v13, %s1364_s3 }
0x132c   :  { %v825_v15 = vpop.permute.xlu1 %824 }
0x132d   :  { %1143 = vmatmul.mubr.msk.f32.vlgmr.msra.gmra.mrb[6].mxu1 %vm69_vm3, %v825_v15 }
0x1400   :  { %v894_v16 = vpop.f32.mrb[6].mxu1 }
0x1401   :  { %v895_v17 = vadd.f32 %v1460_v11, %v894_v16  ;;  %v1144_v18 = vpop.f32.mrb[7].mxu1 }
0x1403   :  { %905 = vrot.lane.b32.xlu0 %v895_v17, %s1363_s0  ;;  %v898_v22 = vadd.f32 %v895_v17, %v62_v20 }
0x1405   :  { %v899_v23 = vsub.f32 0.0, %v898_v22 }
0x1407   :  { %926 = vperm.xlu0 %1208, %v924_v19   ;;  %v900_v24 = vmul.f32 1.442695, %v899_v23 }
0x1409   :  { %1251 = vpow2.f32 %v900_v24 }
0x140b   :  { %941 = vrot.lane.b32.xlu0 %v1530_v21, %s1364_s3 }
0x140f   :  { %945 = vrot.lane.b32.xlu0 %v822_v14, %s1354_s28 }
0x1413   :  { %v1252_v25 = vpop.eup %1251 }
0x1414   :  { %v902_v11 = vadd.f32 1.0, %v1252_v25 }
0x1416   :  { %1253 = vrcp.f32 %v902_v11 }
0x1420   :  { %v1254_v27 = vpop.eup %1253 }
0x1421   :  { %v915_v21 = vsub.f32 1.0, %v1254_v27  ;;  %v921_v0 = vmul.f32 %v1254_v27, %v821_v13 }
0x1475   :  { %v906_v8 = vpop.permute.xlu0 %905 }
0x1476   :  { %v908_v28 = vmul.f32 %v1254_v27, %v906_v8 }
0x1478   :  { %910 = vrot.lane.b32.xlu1 %v908_v28, %s1363_s0 }
0x1486   :  { %v927_v1 = vpop.permute.xlu0 %926 }
0x1487   :  { %vm928_vm1 = vcmp.eq.s32.totalorder %v927_v1, 1 }
0x148a   :  { %v942_v35 = vpop.permute.xlu0 %941 }
0x148e   :  { %v946_v37 = vpop.permute.xlu0 %945 }
0x14ea   :  { %v911_v9 = vpop.permute.xlu1 %910 }
0x14eb   :  { %v913_v5 = vadd.f32 %v911_v9, %v62_v20 }
0x14ed   :  { %1255 = vtanh.f32 %v913_v5 }
0x14f7   :  { %v1256_v29 = vpop.eup %1255 }
0x14f8   :  { %917 = vrot.lane.b32.xlu1 %v1256_v29, %s1364_s3 }
0x14fc   :  { %933 = vrot.lane.b32.xlu1 %v1499_v26, %s1354_s28 }
0x1500   :  { %937 = vrot.lane.b32.xlu1 %v1515_v52, %s1363_s0  ;;  %v957_v52 = vsel %vm69_vm3, %v942_v35, %v1545_v44 }
0x1501   :  { %v958_v39 = vsel %vm953_vm2, %v957_v52, %v946_v37 }
0x156a   :  { %v918_v30 = vpop.permute.xlu1 %917 }
0x156b   :  { %v920_v7 = vmul.f32 %v918_v30, %v915_v21 }
0x156d   :  { %v922_v31 = vadd.f32 %v921_v0, %v920_v7 }
0x156e   :  { %v934_v36 = vpop.permute.xlu1 %933 }
0x156f   :  { %v930_v32 = vsel %vm928_vm1, %v922_v31, 0.0  ;;  %v929_v33 = vsel %vm928_vm1, %v922_v31, %v821_v13  ;;  %v954_v40 = vsel %vm953_vm2, %v952_v38, %v934_v36 }
0x1570   :  { %949 = vrot.lane.b32.xlu0 %v930_v32, %s1363_s0  ;;  %973 = vrot.lane.b32.xlu1 %v929_v33, %s1364_s3 }
0x1572   :  { %v938_v26 = vpop.permute.xlu1 %937 }
0x1573   :  { %v956_v43 = vsel %vm955_vm4, %v954_v40, %v938_v26 }
0x15e2   :  { %v950_v41 = vpop.permute.xlu0 %949  ;;  %v974_v42 = vpop.permute.xlu1 %973 }
0x15e3   :  { %v959_v45 = vsel %vm955_vm4, %v958_v39, %v950_v41  ;;  %977 = vst.msk [vmem:[#allocation8] sm:$0x3] %vm976_vm5, %v974_v42 }
0x15e4   :  { %v962_v46 = vcombine.low %v956_v43, %v959_v45 }
0x15e5   :  { %1312 = shalt.err (!%p1309_p6)
}
0x15e6   :  { %s1313_s30 = scalar_lea.hbm %s1613_s5, 32 }
0x15e7   :  { %p1314_p7 = scmp.ne.s32.totalorder %s1613_s5, %s1313_s30  ;;  %p1317_p8 = scmp.lt.u32.totalorder %s1313_s30, %s1613_s5 }
0x15e9   :  { %p1319_p9 = pnand %p1317_p8, %p1314_p7 }
0x15eb   :  { %1322 = shalt.err (!%p1319_p9)
}
0x15ec   :  { %997 = dma.vmem_to_hbm [thread:$0]  %s995_s24, 32, %s1613_s5, [#allocation9]   ;;  %1016 = vst.sshfl [vmem:[#allocation7] sm:$0x33 pattern:$0x76325410] %v962_v46 }
0x15ed   :  { %s1323_s12 = scalar_lea.vmem %s1577_s26, 64  ;;  %p1328_p11 = scmp.lt.s32.totalorder %s1577_s26, %s1577_s26 }
0x15ee   :  { %p1324_p10 = scmp.ne.s32.totalorder %s1577_s26, %s1323_s12  ;;  %p1329_p12 = scmp.lt.s32.totalorder %s1323_s12, %s1323_s12 }
0x15f0   :  { %p1330_p13 = por %p1329_p12, %p1328_p11 }
0x15f2   :  { %p1331_p0 = pnand %p1330_p13, %p1324_p10 }
0x15f4   :  { %1334 = shalt.err (!%p1331_p0)
}
0x15f5   :  { %s1335_s15 = scalar_lea.hbm %s1612_s4, 64 }
0x15f6   :  { %p1336_p1 = scmp.ne.s32.totalorder %s1612_s4, %s1335_s15  ;;  %p1339_p2 = scmp.lt.u32.totalorder %s1335_s15, %s1612_s4 }
0x15f8   :  { %p1341_p3 = pnand %p1339_p2, %p1336_p1 }
0x15fa   :  { %1344 = shalt.err (!%p1341_p3)
}
0x15fb   :  { %987 = dma.vmem_to_hbm [thread:$0]  %s1577_s26, 64, %s1612_s4, [#allocation4]  }
0x15fc   :  { %1349 = dma.done.wait [#allocation4], 64  }
0x15fd   :  { %1350 = vsyncadd [#allocation4], 4294967232 }
0x15fe   :  { %1351 = dma.done.wait [#allocation9], 32  }
0x15ff   :  { %1352 = vsyncadd [#allocation9], 4294967264 }
0x1600   :  { %1004 = vsyncpa [#allocation3], 1 }
0x1601   :  { %1005 = vsyncpa [#allocation6], 1 }
0x1602   :  { %1006 = vsyncpa [#allocation4], 1 }
0x1603   :  { %1007 = vsyncpa [#allocation9], 1 }

</bundles_post_ra>
